<compile_context>
chip_gen: v7x
topology: tpu7x:2x2x1
jax: 0.10.0
libtpu: 0.0.40
codegen_flags: <defaults>
</compile_context>

<pallas_src>
import jax
import jax.numpy as jnp
from jax.experimental import pallas as pl
from jax.experimental.pallas import tpu as pltpu


def _round_up(x: int, m: int) -> int:
    return ((x + m - 1) // m) * m


def _gatenu_kernel(x_ref, w1_ref, b1_ref, w2_ref, b2_ref, o_ref, *, scale):
    # One batch tile: [TB, K] @ [K, Hp] -> ReLU -> [TB, Hp] @ [Hp, Op] -> sigmoid -> scale.
    x = x_ref[...]
    h = jnp.dot(x, w1_ref[...], preferred_element_type=jnp.float32) + b1_ref[...]
    h = jnp.maximum(h, 0.0)                                   # ReLU
    z = jnp.dot(h, w2_ref[...], preferred_element_type=jnp.float32) + b2_ref[...]
    o_ref[...] = (scale * jax.nn.sigmoid(z)).astype(o_ref.dtype)


def gatenu_forward(x, w1, b1, w2, b2, scale=2.0, block_b=512):
    """Pallas GateNU forward.

    x : [B, input_dim]                (float32)
    w1: [input_dim, hidden_dim], b1: [hidden_dim] or [1, hidden_dim]
    w2: [hidden_dim, output_dim], b2: [output_dim] or [1, output_dim]
    returns: [B, output_dim]
    """
    B, K = x.shape
    H = w1.shape[1]
    O = w2.shape[1]

    b1 = jnp.reshape(b1, (1, H))
    b2 = jnp.reshape(b2, (1, O))

    # Lane-pad hidden/output feature dims to a multiple of 128 (cheap: weights are
    # tiny and resident). Zero padding is exact: padded hidden cols -> ReLU(0)=0
    # and contribute nothing through zero-padded w2 rows; padded output cols are
    # sliced off below.
    Hp = _round_up(H, 128)
    Op = _round_up(O, 128)
    w1p = jnp.pad(w1, ((0, 0), (0, Hp - H))) if Hp != H else w1
    b1p = jnp.pad(b1, ((0, 0), (0, Hp - H))) if Hp != H else b1
    w2p = jnp.pad(w2, ((0, Hp - H), (0, Op - O))) if (Hp != H or Op != O) else w2
    b2p = jnp.pad(b2, ((0, 0), (0, Op - O))) if Op != O else b2

    # Batch tile: large enough to amortize per-step overhead, small enough to fit
    # the most constrained VMEM budget (v5e 16 MiB scoped / v7x 64 MiB physical).
    TB = min(_round_up(block_b, 8), _round_up(B, 8))
    Bp = _round_up(B, TB)
    xp = jnp.pad(x, ((0, Bp - B), (0, 0))) if Bp != B else x

    grid = (Bp // TB,)

    out = pl.pallas_call(
        lambda *refs: _gatenu_kernel(*refs, scale=scale),
        out_shape=jax.ShapeDtypeStruct((Bp, Op), x.dtype),
        grid=grid,
        in_specs=[
            pl.BlockSpec((TB, K), lambda i: (i, 0)),   # x: streamed per batch tile
            pl.BlockSpec((K, Hp), lambda i: (0, 0)),   # w1: resident
            pl.BlockSpec((1, Hp), lambda i: (0, 0)),   # b1: resident
            pl.BlockSpec((Hp, Op), lambda i: (0, 0)),  # w2: resident
            pl.BlockSpec((1, Op), lambda i: (0, 0)),   # b2: resident
        ],
        out_specs=pl.BlockSpec((TB, Op), lambda i: (i, 0)),
        compiler_params=pltpu.CompilerParams(
            dimension_semantics=("parallel",),          # megacore split on v7x
        ),
    )(xp, w1p, b1p, w2p, b2p)

    return out[:B, :O]


if __name__ == "__main__":
    # GateNU(input_dim=32, hidden_dim=64, output_dim=32, scale=2.0)
    B, input_dim, hidden_dim, output_dim = 8, 32, 64, 32
    scale = 2.0

    key = jax.random.PRNGKey(0)
    kx, kw1, kb1, kw2, kb2 = jax.random.split(key, 5)

    x = jax.random.normal(kx, (B, input_dim), dtype=jnp.float32)
    # Deterministic synthetic parameters (roughly torch Linear init scale).
    w1 = jax.random.uniform(kw1, (input_dim, hidden_dim), dtype=jnp.float32,
                            minval=-1.0, maxval=1.0) / jnp.sqrt(input_dim)
    b1 = jax.random.uniform(kb1, (1, hidden_dim), dtype=jnp.float32,
                            minval=-1.0, maxval=1.0) / jnp.sqrt(input_dim)
    w2 = jax.random.uniform(kw2, (hidden_dim, output_dim), dtype=jnp.float32,
                            minval=-1.0, maxval=1.0) / jnp.sqrt(hidden_dim)
    b2 = jax.random.uniform(kb2, (1, output_dim), dtype=jnp.float32,
                            minval=-1.0, maxval=1.0) / jnp.sqrt(hidden_dim)

    out = gatenu_forward(x, w1, b1, w2, b2, scale=scale)
    out = jax.block_until_ready(out)

    # Reference check in plain JAX (same math as the PyTorch module).
    ref = scale * jax.nn.sigmoid(jnp.maximum(x @ w1 + b1, 0.0) @ w2 + b2)
    assert out.shape == (B, output_dim)
    assert jnp.allclose(out, ref, atol=1e-5, rtol=1e-5)

    print("KERNEL_OK")
</pallas_src>

<mosaic_0001>
module attributes {stable_mosaic.version = 11 : i64} {
  func.func @_lambda_(%arg0: i32, %arg1: memref<8x32xf32, #tpu.memory_space<vmem>>, %arg2: memref<32x128xf32, #tpu.memory_space<vmem>>, %arg3: memref<1x128xf32, #tpu.memory_space<vmem>>, %arg4: memref<128x128xf32, #tpu.memory_space<vmem>>, %arg5: memref<1x128xf32, #tpu.memory_space<vmem>>, %arg6: memref<8x128xf32, #tpu.memory_space<vmem>>) attributes {dimension_semantics = [#tpu.dimension_semantics<parallel>], iteration_bounds = array<i64: 1>, scalar_prefetch = 0 : i64, scratch_operands = 0 : i64, tpu.core_type = #tpu.core_type<tc>, window_params = [{transform_indices = @transform_0, window_bounds = array<i64: 8, 32>}, {pipeline_mode = #tpu.pipeline_mode<synchronous>, transform_indices = @transform_1, window_bounds = array<i64: 32, 128>}, {pipeline_mode = #tpu.pipeline_mode<synchronous>, transform_indices = @transform_2, window_bounds = array<i64: 1, 128>}, {pipeline_mode = #tpu.pipeline_mode<synchronous>, transform_indices = @transform_3, window_bounds = array<i64: 128, 128>}, {pipeline_mode = #tpu.pipeline_mode<synchronous>, transform_indices = @transform_4, window_bounds = array<i64: 1, 128>}, {transform_indices = @transform_5, window_bounds = array<i64: 8, 128>}]} {
    %c0 = arith.constant 0 : index
    %c0_0 = arith.constant 0 : index
    %0 = vector.load %arg1[%c0, %c0_0] : memref<8x32xf32, #tpu.memory_space<vmem>>, vector<8x32xf32>
    %c0_1 = arith.constant 0 : index
    %c0_2 = arith.constant 0 : index
    %1 = vector.load %arg2[%c0_1, %c0_2] : memref<32x128xf32, #tpu.memory_space<vmem>>, vector<32x128xf32>
    %cst = arith.constant dense<0.000000e+00> : vector<8x128xf32>
    %2 = tpu.matmul %0, %1, %cst {dimension_numbers = #tpu.dot_dimension_numbers<[1], [0], [0], [1], [0, 0, 1, 1], [], []>} : vector<8x32xf32>, vector<32x128xf32>, vector<8x128xf32> -> vector<8x128xf32>
    %c0_3 = arith.constant 0 : index
    %c0_4 = arith.constant 0 : index
    %3 = vector.load %arg3[%c0_3, %c0_4] : memref<1x128xf32, #tpu.memory_space<vmem>>, vector<1x128xf32>
    %4 = vector.broadcast %3 : vector<1x128xf32> to vector<8x128xf32>
    %5 = arith.addf %2, %4 : vector<8x128xf32>
    %cst_5 = arith.constant 0.000000e+00 : f32
    %6 = vector.broadcast %cst_5 : f32 to vector<8x128xf32>
    %7 = arith.maximumf %5, %6 : vector<8x128xf32>
    %c0_6 = arith.constant 0 : index
    %c0_7 = arith.constant 0 : index
    %8 = vector.load %arg4[%c0_6, %c0_7] : memref<128x128xf32, #tpu.memory_space<vmem>>, vector<128x128xf32>
    %cst_8 = arith.constant dense<0.000000e+00> : vector<8x128xf32>
    %9 = tpu.matmul %7, %8, %cst_8 {dimension_numbers = #tpu.dot_dimension_numbers<[1], [0], [0], [1], [0, 0, 1, 1], [], []>} : vector<8x128xf32>, vector<128x128xf32>, vector<8x128xf32> -> vector<8x128xf32>
    %c0_9 = arith.constant 0 : index
    %c0_10 = arith.constant 0 : index
    %10 = vector.load %arg5[%c0_9, %c0_10] : memref<1x128xf32, #tpu.memory_space<vmem>>, vector<1x128xf32>
    %11 = vector.broadcast %10 : vector<1x128xf32> to vector<8x128xf32>
    %12 = arith.addf %9, %11 : vector<8x128xf32>
    %13 = arith.negf %12 : vector<8x128xf32>
    %14 = math.exp %13 : vector<8x128xf32>
    %cst_11 = arith.constant 1.000000e+00 : f32
    %15 = vector.broadcast %cst_11 : f32 to vector<8x128xf32>
    %16 = arith.addf %15, %14 : vector<8x128xf32>
    %17 = arith.divf %15, %16 : vector<8x128xf32>
    %cst_12 = arith.constant 2.000000e+00 : f32
    %18 = vector.broadcast %cst_12 : f32 to vector<8x128xf32>
    %19 = arith.mulf %18, %17 : vector<8x128xf32>
    %c0_13 = arith.constant 0 : index
    %c0_14 = arith.constant 0 : index
    %20 = vector.load %arg6[%c0_13, %c0_14] : memref<8x128xf32, #tpu.memory_space<vmem>>, vector<8x128xf32>
    tpu.vector_store %arg6[%c0_13, %c0_14], %19 {strides = array<i32>} : memref<8x128xf32, #tpu.memory_space<vmem>>, vector<8x128xf32>,
    return
  }
  func.func @transform_0(%arg0: i32) -> (i32, i32) {
    %c0_i32 = arith.constant 0 : i32
    %c0_i32_0 = arith.constant 0 : i32
    return %arg0, %c0_i32 : i32, i32
  }
  func.func @transform_1(%arg0: i32) -> (i32, i32) {
    %c0_i32 = arith.constant 0 : i32
    %c0_i32_0 = arith.constant 0 : i32
    %c0_i32_1 = arith.constant 0 : i32
    return %c0_i32, %c0_i32_0 : i32, i32
  }
  func.func @transform_2(%arg0: i32) -> (i32, i32) {
    %c0_i32 = arith.constant 0 : i32
    %c0_i32_0 = arith.constant 0 : i32
    %c0_i32_1 = arith.constant 0 : i32
    return %c0_i32, %c0_i32_0 : i32, i32
  }
  func.func @transform_3(%arg0: i32) -> (i32, i32) {
    %c0_i32 = arith.constant 0 : i32
    %c0_i32_0 = arith.constant 0 : i32
    %c0_i32_1 = arith.constant 0 : i32
    return %c0_i32, %c0_i32_0 : i32, i32
  }
  func.func @transform_4(%arg0: i32) -> (i32, i32) {
    %c0_i32 = arith.constant 0 : i32
    %c0_i32_0 = arith.constant 0 : i32
    %c0_i32_1 = arith.constant 0 : i32
    return %c0_i32, %c0_i32_0 : i32, i32
  }
  func.func @transform_5(%arg0: i32) -> (i32, i32) {
    %c0_i32 = arith.constant 0 : i32
    %c0_i32_0 = arith.constant 0 : i32
    return %arg0, %c0_i32 : i32, i32
  }
}

</mosaic_0001>

<bundles_post_ra>
// kernel: tpu_custom_call.1
= control target key start
LH: loop header
LB: loop body
LE: loop exit
PB: predicated region body
PF: predicated region fallthrough
CT: control target
= control target key end

     0   :  { %10 = vsyncpa [#allocation3], 0  ;;  %s572_s0 = inlined_call_operand.hbm [shape: f32[8,32], index: 0, kind: input, shape index: {}]   ;;  %s573_s1 = inlined_call_operand.hbm [shape: f32[32,128], index: 1, kind: input, shape index: {}]   ;;  %s574_s2 = inlined_call_operand.vmem [shape: f32[1,128], index: 2, kind: input, shape index: {}]   ;;  %s575_s3 = inlined_call_operand.hbm [shape: f32[128,128], index: 3, kind: input, shape index: {}]   ;;  %s576_s4 = inlined_call_operand.vmem [shape: f32[1,128], index: 4, kind: input, shape index: {}]   ;;  %s577_s5 = inlined_call_operand.hbm [shape: f32[8,128], index: 5, kind: output, shape index: {}]  }
   0x1   :  { %11 = vsyncpa [#allocation6], 0 }
   0x2   :  { %12 = vsyncpa [#allocation4], 0  ;;  %s473_s18 = smov [#allocation5]   ;;  %s379_s22 = scalar_lea.hbm %s573_s1, 512 }
   0x3   :  { %s28_s19 = sshll.u32 %s473_s18, 4  ;;  %p380_p0 = scmp.ne.s32.totalorder %s573_s1, %s379_s22  ;;  %s29_s19 = int_to_ptr.vmem [resolvable:$true] %s28_s19 }
   0x4   :  { %p383_p1 = scmp.lt.u32.totalorder %s379_s22, %s573_s1 }
   0x6   :  { %p385_p2 = pnand %p383_p1, %p380_p0 }
   0x8   :  { %388 = shalt.err (!%p385_p2)
}
   0x9   :  { %s389_s27 = scalar_lea.vmem %s29_s19, 512  ;;  %p394_p4 = scmp.lt.s32.totalorder %s29_s19, %s29_s19 }
   0xa   :  { %p390_p3 = scmp.ne.s32.totalorder %s29_s19, %s389_s27  ;;  %p395_p5 = scmp.lt.s32.totalorder %s389_s27, %s389_s27 }
   0xc   :  { %p396_p6 = por %p395_p5, %p394_p4 }
   0xe   :  { %p397_p7 = pnand %p396_p6, %p390_p3 }
  0x10   :  { %400 = shalt.err (!%p397_p7)
}
  0x11   :  { %s474_s28 = smov 128   ;;  %s475_s29 = smov 8  }
  0x12   :  { %34 = dma.hbm_to_vmem [thread:$0]  %s573_s1, 512, %s29_s19, [#allocation6], %s474_s28, %s474_s28, %s475_s29  }
  0x13   :  { %s476_s7 = smov [#allocation2]   ;;  %s477_s9 = smov [#allocation7]  }
  0x14   :  { %s19_s8 = sshll.u32 %s476_s7, 4  ;;  %s42_s10 = sshll.u32 %s477_s9, 4  ;;  %s20_s8 = int_to_ptr.vmem [resolvable:$true] %s19_s8  ;;  %s43_s10 = int_to_ptr.vmem [resolvable:$true] %s42_s10 }
  0x15   :  { %s401_s13 = scalar_lea.hbm %s572_s0, 128 }
  0x16   :  { %p402_p8 = scmp.ne.s32.totalorder %s572_s0, %s401_s13  ;;  %p405_p9 = scmp.lt.u32.totalorder %s401_s13, %s572_s0 }
  0x18   :  { %p407_p10 = pnand %p405_p9, %p402_p8 }
  0x1a   :  { %410 = shalt.err (!%p407_p10)
}
  0x1b   :  { %s411_s1 = scalar_lea.vmem %s20_s8, 128  ;;  %p416_p12 = scmp.lt.s32.totalorder %s20_s8, %s20_s8 }
  0x1c   :  { %p412_p11 = scmp.ne.s32.totalorder %s20_s8, %s411_s1  ;;  %p417_p13 = scmp.lt.s32.totalorder %s411_s1, %s411_s1 }
  0x1e   :  { %p418_p0 = por %p417_p13, %p416_p12 }
  0x20   :  { %p419_p1 = pnand %p418_p0, %p412_p11 }
  0x22   :  { %422 = shalt.err (!%p419_p1)
}
  0x23   :  { %22 = dma.hbm_to_vmem [thread:$0]  %s572_s0, 128, %s20_s8, [#allocation3]  }
  0x24   :  { %s423_s22 = scalar_lea.hbm %s575_s3, 2048 }
  0x25   :  { %p424_p2 = scmp.ne.s32.totalorder %s575_s3, %s423_s22  ;;  %p427_p3 = scmp.lt.u32.totalorder %s423_s22, %s575_s3 }
  0x27   :  { %p429_p4 = pnand %p427_p3, %p424_p2 }
  0x29   :  { %432 = shalt.err (!%p429_p4)
}
  0x2a   :  { %s433_s27 = scalar_lea.vmem %s43_s10, 2048  ;;  %p438_p6 = scmp.lt.s32.totalorder %s43_s10, %s43_s10 }
  0x2b   :  { %p434_p5 = scmp.ne.s32.totalorder %s43_s10, %s433_s27  ;;  %p439_p7 = scmp.lt.s32.totalorder %s433_s27, %s433_s27 }
  0x2d   :  { %p440_p8 = por %p439_p7, %p438_p6 }
  0x2f   :  { %p441_p9 = pnand %p440_p8, %p434_p5 }
  0x31   :  { %444 = shalt.err (!%p441_p9)
}
  0x32   :  { %48 = dma.hbm_to_vmem [thread:$0]  %s575_s3, 2048, %s43_s10, [#allocation6], %s474_s28, %s474_s28, %s475_s29  }
  0x33   :  { %467 = dma.done.wait [#allocation3], 128  }
  0x34   :  { %468 = vsyncadd [#allocation3], 4294967168 }
  0x35   :  { %469 = dma.done.wait [#allocation6], 2560  }
  0x36   :  { %470 = vsyncadd [#allocation6], 4294964736  ;;  %v478_v0 = vmov 0.0|0.0   ;;  %vm479_vm0 = vmmov 0   ;;  %v480_v1 = vmov 0.0   ;;  %v61_v2 = vld [vmem:[#allocation5] sm:$0xff] }
  0x37   :  { %336 = vmatprep.subr.bf16.mxu0 %v478_v0  ;;  %298 = vmatprep.mubr.msk.f32.mxu0 %vm479_vm0, %v480_v1  ;;  %v62_v3 = vld [vmem:[#allocation5 + $0x8] sm:$0xff]  ;;  %v63_v4 = vld [vmem:[#allocation5 + $0x10] sm:$0xff]  ;;  %v64_v6 = vld [vmem:[#allocation5 + $0x18] sm:$0xff]  ;;  %vm72_vm1 = vcmask 261120   ;;  %s481_s7 = smov [#allocation8]  }
  0x38   :  { %342 = vmatprep.subr.bf16.mxu1 %v478_v0  ;;  %333 = vmatprep.mubr.msk.f32.mxu1 %vm479_vm0, %v480_v1  ;;  %v337_v5 = vpack.c.bf16 %v62_v3, %v61_v2  ;;  %v147_v7 = vld [vmem:[#allocation7] sm:$0xff]  ;;  %v148_v8 = vld [vmem:[#allocation7 + $0x8] sm:$0xff]  ;;  %v149_v9 = vld [vmem:[#allocation7 + $0x10] sm:$0xff]  ;;  %v340_v11 = vpack.c.bf16 %v64_v6, %v63_v4  ;;  %s254_s8 = sshll.u32 %s481_s7, 4  ;;  %s255_s8 = int_to_ptr.vmem [resolvable:$true] %s254_s8 }
  0x39   :  { %v150_v10 = vld [vmem:[#allocation7 + $0x18] sm:$0xff]  ;;  %v343_v12 = vpack.c.bf16 %v148_v8, %v147_v7  ;;  %v151_v14 = vld [vmem:[#allocation7 + $0x20] sm:$0xff]  ;;  %v152_v15 = vld [vmem:[#allocation7 + $0x28] sm:$0xff]  ;;  %p450_p11 = scmp.lt.s32.totalorder %s255_s8, %s255_s8 }
  0x3a   :  { %338 = vmatpush3.bf16.msra.mxu0 %v337_v5  ;;  %v346_v13 = vpack.c.bf16 %v150_v10, %v149_v9  ;;  %v60_v16 = vld [vmem:[#allocation2] sm:$0xff]  ;;  %v349_v17 = vpack.c.bf16 %v152_v15, %v151_v14  ;;  %v153_v18 = vld [vmem:[#allocation7 + $0x30] sm:$0xff]  ;;  %v155_v21 = vld [vmem:[#allocation7 + $0x40] sm:$0xff] }
  0x3b   :  { %339 = vmatprep.subr.bf16.mxu0 %v478_v0  ;;  %344 = vmatpush3.bf16.msra.mxu1 %v343_v12  ;;  %v154_v19 = vld [vmem:[#allocation7 + $0x38] sm:$0xff]  ;;  %v156_v22 = vld [vmem:[#allocation7 + $0x48] sm:$0xff]  ;;  %v157_v24 = vld [vmem:[#allocation7 + $0x50] sm:$0xff] }
  0x3c   :  { %345 = vmatprep.subr.bf16.mxu1 %v478_v0  ;;  %v352_v20 = vpack.c.bf16 %v154_v19, %v153_v18  ;;  %v355_v23 = vpack.c.bf16 %v156_v22, %v155_v21  ;;  %v158_v25 = vld [vmem:[#allocation7 + $0x58] sm:$0xff]  ;;  %v159_v27 = vld [vmem:[#allocation7 + $0x60] sm:$0xff]  ;;  %v160_v28 = vld [vmem:[#allocation7 + $0x68] sm:$0xff] }
  0x3d   :  { %v358_v26 = vpack.c.bf16 %v158_v25, %v157_v24  ;;  %v361_v29 = vpack.c.bf16 %v160_v28, %v159_v27  ;;  %v161_v30 = vld [vmem:[#allocation7 + $0x70] sm:$0xff]  ;;  %v162_v31 = vld [vmem:[#allocation7 + $0x78] sm:$0xff] }
  0x3e   :  { %341 = vmatpush3.bf16.msra.mxu0 %v340_v11  ;;  %v364_v32 = vpack.c.bf16 %v162_v31, %v161_v30  ;;  %v264_v33 = vld [vmem:[%s574_s2] ss:$0 sm:$0xff]  ;;  %s445_s2 = scalar_lea.vmem %s255_s8, 128 }
  0x3f   :  { %347 = vmatpush3.bf16.msra.mxu1 %v346_v13  ;;  %v266_v38 = vld [vmem:[%s576_s4] ss:$0 sm:$0xff]  ;;  %p446_p10 = scmp.ne.s32.totalorder %s255_s8, %s445_s2  ;;  %p451_p12 = scmp.lt.s32.totalorder %s445_s2, %s445_s2 }
  0x40   :  { %348 = vmatprep.subr.bf16.mxu1 %v478_v0 }
  0x41   :  { %299 = vmatmul.mubr.msk.f32.vlgmr.msra.gmra.mrb[0].mxu0 %vm72_vm1, %v60_v16  ;;  %p452_p13 = por %p451_p12, %p450_p11 }
  0x43   :  { %350 = vmatpush3.bf16.msra.mxu1 %v349_v17  ;;  %p453_p0 = pnand %p452_p13, %p446_p10 }
  0x44   :  { %351 = vmatprep.subr.bf16.mxu1 %v478_v0 }
  0x47   :  { %353 = vmatpush3.bf16.msra.mxu1 %v352_v20 }
  0x48   :  { %354 = vmatprep.subr.bf16.mxu1 %v478_v0 }
  0x4b   :  { %356 = vmatpush3.bf16.msra.mxu1 %v355_v23 }
  0x4c   :  { %357 = vmatprep.subr.bf16.mxu1 %v478_v0 }
  0x4f   :  { %359 = vmatpush3.bf16.msra.mxu1 %v358_v26 }
  0x50   :  { %360 = vmatprep.subr.bf16.mxu1 %v478_v0 }
  0x53   :  { %362 = vmatpush3.bf16.msra.mxu1 %v361_v29 }
  0x54   :  { %363 = vmatprep.subr.bf16.mxu1 %v478_v0 }
  0x57   :  { %365 = vmatpush3.bf16.msra.mxu1 %v364_v32 }
 0x114   :  { %v142_v34 = vpop.f32.mrb[0].mxu0 }
 0x115   :  { %v143_v35 = vadd.f32 %v264_v33, %v142_v34  ;;  %v300_v36 = vpop.f32.mrb[1].mxu0 }
 0x117   :  { %v146_v37 = vmax.f32 %v143_v35, 0.0 }
 0x119   :  { %334 = vmatmul.mubr.f32.vlgmr.msra.gmra.mrb[0].mxu1 %v146_v37 }
 0x1ec   :  { %v236_v39 = vpop.f32.mrb[0].mxu1 }
 0x1ed   :  { %v237_v40 = vadd.f32 %v266_v38, %v236_v39  ;;  %v335_v41 = vpop.f32.mrb[1].mxu1 }
 0x1ef   :  { %v267_v42 = vmul.f32 -1.442695, %v237_v40 }
 0x1f1   :  { %375 = vpow2.f32 %v267_v42 }
 0x1fb   :  { %v376_v43 = vpop.eup %375 }
 0x1fc   :  { %v243_v44 = vadd.f32 1.0, %v376_v43 }
 0x1fe   :  { %377 = vrcp.f32 %v243_v44 }
 0x208   :  { %v378_v45 = vpop.eup %377 }
 0x209   :  { %v246_v46 = vmul.f32 2.0, %v378_v45 }
 0x20b   :  { %247 = vst [vmem:[#allocation8] sm:$0xff] %v246_v46 }
 0x20c   :  { %456 = shalt.err (!%p453_p0)
}
 0x20d   :  { %s457_s10 = scalar_lea.hbm %s577_s5, 128 }
 0x20e   :  { %p458_p1 = scmp.ne.s32.totalorder %s577_s5, %s457_s10  ;;  %p461_p2 = scmp.lt.u32.totalorder %s457_s10, %s577_s5 }
 0x210   :  { %p463_p3 = pnand %p461_p2, %p458_p1 }
 0x212   :  { %466 = shalt.err (!%p463_p3)
}
 0x213   :  { %257 = dma.vmem_to_hbm [thread:$0]  %s255_s8, 128, %s577_s5, [#allocation4]  }
 0x214   :  { %471 = dma.done.wait [#allocation4], 128  }
 0x215   :  { %472 = vsyncadd [#allocation4], 4294967168 }
 0x216   :  { %261 = vsyncpa [#allocation3], 1 }
 0x217   :  { %262 = vsyncpa [#allocation6], 1 }
 0x218   :  { %263 = vsyncpa [#allocation4], 1 }

</bundles_post_ra>
